<compile_context>
chip_gen: v5e
topology: v5e:2x2
jax: 0.10.0
libtpu: 0.0.40
codegen_flags: <defaults>
</compile_context>

<pallas_src>
import jax
import jax.numpy as jnp
from jax.experimental import pallas as pl
from jax.experimental.pallas import tpu as pltpu


# --- packed parameter slab layout --------------------------------------------
#   rows  0: 8  -> W1 (8 x 6), zero padded to (8, 128)
#   rows  8:16  -> W2 (6 x 4), zero padded
#   rows 16:24  -> W3 (4 x 2), zero padded
#   rows 24:32  -> W4 (2 x 1), zero padded
#   rows 32:36  -> b1..b4, one bias per row, zero padded to 128 lanes
LAYER_DIMS = ((8, 6), (6, 4), (4, 2), (2, 1))
_W_ROWS = 8                      # rows reserved per weight block
_B_ROW0 = 4 * _W_ROWS            # first bias row (= 32)
_SLAB_ROWS = _B_ROW0 + 8         # 40 rows total (multiple of 8)
_LANES = 128                     # lane width (vreg lane count)


def pack_params(params):
    """Pack ((W1,b1),...,(W4,b4)) into one (40, 128) f32 zero-padded slab."""
    slab = jnp.zeros((_SLAB_ROWS, _LANES), jnp.float32)
    for i, (w, b) in enumerate(params):
        fan_in, fan_out = w.shape
        slab = slab.at[i * _W_ROWS:i * _W_ROWS + fan_in, :fan_out].set(
            jnp.asarray(w, jnp.float32))
        slab = slab.at[_B_ROW0 + i, :fan_out].set(
            jnp.asarray(b, jnp.float32).reshape(-1))
    return slab


def mlp_kernel(x_ref, p_ref, o_ref):
    h = x_ref[...]                                              # (TM, 8)
    for li in range(4):
        w = p_ref[li * _W_ROWS:(li + 1) * _W_ROWS, :]           # (8, 128)
        b = p_ref[_B_ROW0 + li:_B_ROW0 + li + 1, :]             # (1, 128)
        h = jnp.dot(h, w, preferred_element_type=jnp.float32)   # (TM, 128)
        h = jnp.maximum(h + b, 0.0)
        if li < 3:
            # Next layer's fan_in <= 8; lanes >= true fan_out (and the
            # matching zero-padded weight rows) are zero, so this is exact.
            h = h[:, :_W_ROWS]
    # Only lane 0 is meaningful: store the logical (TM, 1) result directly.
    o_ref[...] = h[:, :1].astype(o_ref.dtype)


def _round_up(x, m):
    return ((x + m - 1) // m) * m


def mlp_forward(x, slab, *, tm=4096):
    """x: (B, 8) f32, slab: packed params -> (B, 1) f32."""
    B, F = x.shape

    if B <= 8:
        # Single full-extent tile (block == full array dims is always legal).
        TM = B
    else:
        tm = max(8, (tm // 8) * 8)                   # enforce multiple of 8
        half = max(8, _round_up(pl.cdiv(B, 2), 8))   # >=2 tiles -> both v7x TCs work
        TM = min(tm, half)
    grid = (pl.cdiv(B, TM),)

    flops = 2 * B * sum(fi * fo for fi, fo in LAYER_DIMS)
    bytes_accessed = (x.size + slab.size + B * 1) * 4

    return pl.pallas_call(
        mlp_kernel,
        out_shape=jax.ShapeDtypeStruct((B, 1), jnp.float32),
        grid=grid,
        in_specs=[
            pl.BlockSpec((TM, F), lambda i: (i, 0)),               # batch tile
            pl.BlockSpec((_SLAB_ROWS, _LANES), lambda i: (0, 0)),  # grid-invariant
        ],
        out_specs=pl.BlockSpec((TM, 1), lambda i: (i, 0)),
        compiler_params=pltpu.CompilerParams(
            dimension_semantics=("parallel",)),
        cost_estimate=pl.CostEstimate(
            flops=flops, transcendentals=0, bytes_accessed=bytes_accessed),
    )(x, slab)


def init_linear(key, fan_in, fan_out):
    """Deterministic init mimicking PyTorch's default Linear init
    (uniform in [-1/sqrt(fan_in), 1/sqrt(fan_in)]); stored as (in, out)."""
    kw, kb = jax.random.split(key)
    bound = 1.0 / jnp.sqrt(float(fan_in))
    w = jax.random.uniform(kw, (fan_in, fan_out), jnp.float32, -bound, bound)
    b = jax.random.uniform(kb, (1, fan_out), jnp.float32, -bound, bound)
    return w, b


if __name__ == "__main__":
    root = jax.random.PRNGKey(0)
    k_x, k1, k2, k3, k4 = jax.random.split(root, 5)

    B = 8
    x = jax.random.normal(k_x, (B, 8), jnp.float32)

    params = tuple(
        init_linear(k, fi, fo)
        for k, (fi, fo) in zip((k1, k2, k3, k4), LAYER_DIMS)
    )
    slab = pack_params(params)

    out = jax.block_until_ready(mlp_forward(x, slab))

    # Cross-check against a plain-JAX reference of the same forward pass.
    ref = x
    for (w, b) in params:
        ref = jnp.maximum(ref @ w + b, 0.0)

    assert out.shape == (B, 1)
    assert jnp.allclose(out, ref, atol=1e-5, rtol=1e-5)

    # Also sanity-check a larger batch that exercises tiling + partial tiles.
    B2 = 1000
    x2 = jax.random.normal(jax.random.PRNGKey(1), (B2, 8), jnp.float32)
    out2 = jax.block_until_ready(mlp_forward(x2, slab))
    ref2 = x2
    for (w, b) in params:
        ref2 = jnp.maximum(ref2 @ w + b, 0.0)
    assert out2.shape == (B2, 1)
    assert jnp.allclose(out2, ref2, atol=1e-5, rtol=1e-5)

    print("KERNEL_OK")
</pallas_src>

<mosaic_0001>
module attributes {stable_mosaic.version = 11 : i64} {
  func.func @mlp_kernel(%arg0: i32, %arg1: memref<8x8xf32, #tpu.memory_space<vmem>>, %arg2: memref<40x128xf32, #tpu.memory_space<vmem>>, %arg3: memref<8x1xf32, #tpu.memory_space<vmem>>) attributes {dimension_semantics = [#tpu.dimension_semantics<parallel>], iteration_bounds = array<i64: 1>, scalar_prefetch = 0 : i64, scratch_operands = 0 : i64, tpu.core_type = #tpu.core_type<tc>, window_params = [{transform_indices = @transform_0, window_bounds = array<i64: 8, 8>}, {pipeline_mode = #tpu.pipeline_mode<synchronous>, transform_indices = @transform_1, window_bounds = array<i64: 40, 128>}, {transform_indices = @transform_2, window_bounds = array<i64: 8, 1>}]} {
    %c0 = arith.constant 0 : index
    %c0_0 = arith.constant 0 : index
    %0 = vector.load %arg1[%c0, %c0_0] : memref<8x8xf32, #tpu.memory_space<vmem>>, vector<8x8xf32>
    %c0_1 = arith.constant 0 : index
    %c0_2 = arith.constant 0 : index
    %1 = vector.load %arg2[%c0_1, %c0_2] : memref<40x128xf32, #tpu.memory_space<vmem>>, vector<8x128xf32>
    %c32 = arith.constant 32 : index
    %c0_3 = arith.constant 0 : index
    %2 = vector.load %arg2[%c32, %c0_3] : memref<40x128xf32, #tpu.memory_space<vmem>>, vector<1x128xf32>
    %cst = arith.constant dense<0.000000e+00> : vector<8x128xf32>
    %3 = tpu.matmul %0, %1, %cst {dimension_numbers = #tpu.dot_dimension_numbers<[1], [0], [0], [1], [0, 0, 1, 1], [], []>} : vector<8x8xf32>, vector<8x128xf32>, vector<8x128xf32> -> vector<8x128xf32>
    %4 = vector.broadcast %2 : vector<1x128xf32> to vector<8x128xf32>
    %5 = arith.addf %3, %4 : vector<8x128xf32>
    %cst_4 = arith.constant 0.000000e+00 : f32
    %6 = vector.broadcast %cst_4 : f32 to vector<8x128xf32>
    %7 = arith.maximumf %5, %6 : vector<8x128xf32>
    %8 = vector.extract_strided_slice %7 {offsets = [0, 0], sizes = [8, 8], strides = [1, 1]} : vector<8x128xf32> to vector<8x8xf32>
    %c8 = arith.constant 8 : index
    %c0_5 = arith.constant 0 : index
    %9 = vector.load %arg2[%c8, %c0_5] : memref<40x128xf32, #tpu.memory_space<vmem>>, vector<8x128xf32>
    %c33 = arith.constant 33 : index
    %c0_6 = arith.constant 0 : index
    %10 = vector.load %arg2[%c33, %c0_6] : memref<40x128xf32, #tpu.memory_space<vmem>>, vector<1x128xf32>
    %cst_7 = arith.constant dense<0.000000e+00> : vector<8x128xf32>
    %11 = tpu.matmul %8, %9, %cst_7 {dimension_numbers = #tpu.dot_dimension_numbers<[1], [0], [0], [1], [0, 0, 1, 1], [], []>} : vector<8x8xf32>, vector<8x128xf32>, vector<8x128xf32> -> vector<8x128xf32>
    %12 = vector.broadcast %10 : vector<1x128xf32> to vector<8x128xf32>
    %13 = arith.addf %11, %12 : vector<8x128xf32>
    %cst_8 = arith.constant 0.000000e+00 : f32
    %14 = vector.broadcast %cst_8 : f32 to vector<8x128xf32>
    %15 = arith.maximumf %13, %14 : vector<8x128xf32>
    %16 = vector.extract_strided_slice %15 {offsets = [0, 0], sizes = [8, 8], strides = [1, 1]} : vector<8x128xf32> to vector<8x8xf32>
    %c16 = arith.constant 16 : index
    %c0_9 = arith.constant 0 : index
    %17 = vector.load %arg2[%c16, %c0_9] : memref<40x128xf32, #tpu.memory_space<vmem>>, vector<8x128xf32>
    %c34 = arith.constant 34 : index
    %c0_10 = arith.constant 0 : index
    %18 = vector.load %arg2[%c34, %c0_10] : memref<40x128xf32, #tpu.memory_space<vmem>>, vector<1x128xf32>
    %cst_11 = arith.constant dense<0.000000e+00> : vector<8x128xf32>
    %19 = tpu.matmul %16, %17, %cst_11 {dimension_numbers = #tpu.dot_dimension_numbers<[1], [0], [0], [1], [0, 0, 1, 1], [], []>} : vector<8x8xf32>, vector<8x128xf32>, vector<8x128xf32> -> vector<8x128xf32>
    %20 = vector.broadcast %18 : vector<1x128xf32> to vector<8x128xf32>
    %21 = arith.addf %19, %20 : vector<8x128xf32>
    %cst_12 = arith.constant 0.000000e+00 : f32
    %22 = vector.broadcast %cst_12 : f32 to vector<8x128xf32>
    %23 = arith.maximumf %21, %22 : vector<8x128xf32>
    %24 = vector.extract_strided_slice %23 {offsets = [0, 0], sizes = [8, 8], strides = [1, 1]} : vector<8x128xf32> to vector<8x8xf32>
    %c24 = arith.constant 24 : index
    %c0_13 = arith.constant 0 : index
    %25 = vector.load %arg2[%c24, %c0_13] : memref<40x128xf32, #tpu.memory_space<vmem>>, vector<8x128xf32>
    %c35 = arith.constant 35 : index
    %c0_14 = arith.constant 0 : index
    %26 = vector.load %arg2[%c35, %c0_14] : memref<40x128xf32, #tpu.memory_space<vmem>>, vector<1x128xf32>
    %cst_15 = arith.constant dense<0.000000e+00> : vector<8x128xf32>
    %27 = tpu.matmul %24, %25, %cst_15 {dimension_numbers = #tpu.dot_dimension_numbers<[1], [0], [0], [1], [0, 0, 1, 1], [], []>} : vector<8x8xf32>, vector<8x128xf32>, vector<8x128xf32> -> vector<8x128xf32>
    %28 = vector.broadcast %26 : vector<1x128xf32> to vector<8x128xf32>
    %29 = arith.addf %27, %28 : vector<8x128xf32>
    %cst_16 = arith.constant 0.000000e+00 : f32
    %30 = vector.broadcast %cst_16 : f32 to vector<8x128xf32>
    %31 = arith.maximumf %29, %30 : vector<8x128xf32>
    %32 = vector.extract_strided_slice %31 {offsets = [0, 0], sizes = [8, 1], strides = [1, 1]} : vector<8x128xf32> to vector<8x1xf32>
    %c0_17 = arith.constant 0 : index
    %c0_18 = arith.constant 0 : index
    %33 = vector.load %arg3[%c0_17, %c0_18] : memref<8x1xf32, #tpu.memory_space<vmem>>, vector<8x1xf32>
    tpu.vector_store %arg3[%c0_17, %c0_18], %32 {strides = array<i32>} : memref<8x1xf32, #tpu.memory_space<vmem>>, vector<8x1xf32>,
    return
  }
  func.func @transform_0(%arg0: i32) -> (i32, i32) {
    %c0_i32 = arith.constant 0 : i32
    %c0_i32_0 = arith.constant 0 : i32
    return %arg0, %c0_i32 : i32, i32
  }
  func.func @transform_1(%arg0: i32) -> (i32, i32) {
    %c0_i32 = arith.constant 0 : i32
    %c0_i32_0 = arith.constant 0 : i32
    %c0_i32_1 = arith.constant 0 : i32
    return %c0_i32, %c0_i32_0 : i32, i32
  }
  func.func @transform_2(%arg0: i32) -> (i32, i32) {
    %c0_i32 = arith.constant 0 : i32
    %c0_i32_0 = arith.constant 0 : i32
    return %arg0, %c0_i32 : i32, i32
  }
}

</mosaic_0001>

<bundles_post_ra>
// kernel: tpu_custom_call.1
= control target key start
LH: loop header
LB: loop body
LE: loop exit
PB: predicated region body
PF: predicated region fallthrough
CT: control target
= control target key end

     0   :  { %7 = vsyncpa [#allocation3], 0  ;;  %s255_s0 = inlined_call_operand.hbm [shape: f32[8,8], index: 0, kind: input, shape index: {}]   ;;  %s256_s1 = inlined_call_operand.hbm [shape: f32[40,128], index: 1, kind: input, shape index: {}]   ;;  %s257_s2 = inlined_call_operand.vmem [shape: f32[8,1], index: 2, kind: output, shape index: {}]  }
   0x1   :  { %s14_s11 = sshll.u32 %s255_s0, 4  ;;  %s15_s11 = int_to_ptr.hbm [resolvable:$true] %s14_s11 }
   0x2   :  { %8 = vsyncpa [#allocation5], 0  ;;  %s223_s12 = smov [#allocation2]   ;;  %s24_s16 = sshll.u32 %s256_s1, 4  ;;  %s25_s16 = int_to_ptr.hbm [resolvable:$true] %s24_s16 }
   0x3   :  { %s16_s13 = sshll.u32 %s223_s12, 4  ;;  %s224_s17 = smov [#allocation4]   ;;  %s17_s13 = int_to_ptr.vmem [resolvable:$true] %s16_s13 }
   0x4   :  { %19 = dma.hbm_to_vmem [thread:$0]  %s15_s11, 128, %s17_s13, [#allocation3]  }
   0x5   :  { %s26_s18 = sshll.u32 %s224_s17, 4  ;;  %s225_s19 = smov 128   ;;  %s27_s18 = int_to_ptr.vmem [resolvable:$true] %s26_s18 }
   0x6   :  { %s226_s20 = smov 8  }
   0x7   :  { %32 = dma.hbm_to_vmem [thread:$0]  %s25_s16, 640, %s27_s18, [#allocation5], %s225_s19, %s225_s19, %s226_s20  }
   0x8   :  { %219 = dma.done.wait [#allocation3], 128  }
   0x9   :  { %220 = vsyncadd [#allocation3], 4294967168 }
   0xa   :  { %221 = dma.done.wait [#allocation5], 640  }
   0xb   :  { %222 = vsyncadd [#allocation5], 4294966656  ;;  %vm45_vm0 = vcmask 64512   ;;  %v42_v0 = vld [vmem:[#allocation4] sm:$0xff]  ;;  %v41_v1 = vld [vmem:[#allocation2] sm:$0xff]  ;;  %vm151_vm1 = vcmask 7168  }
   0xc   :  { %64 = vmatpush.msra.mxu0 %v42_v0  ;;  %v70_v2 = vld [vmem:[#allocation4 + $0x8] sm:$0xff]  ;;  %v167_v3 = vld [vmem:[#allocation4 + $0x20] ss:$0 sm:$0xff]  ;;  %v97_v7 = vld [vmem:[#allocation4 + $0x10] sm:$0xff] }
   0xd   :  { %159 = vmatmul.msk.f32.vlgmr.msra.gmra.mxu0 %vm45_vm0, %v41_v1  ;;  %91 = vmatpush.msra.mxu1 %v70_v2  ;;  %v168_v8 = vld [vmem:[#allocation4 + $0x21] ss:$0 sm:$0xff]  ;;  %v124_v12 = vld [vmem:[#allocation4 + $0x18] sm:$0xff]  ;;  %v169_v13 = vld [vmem:[#allocation4 + $0x22] ss:$0 sm:$0xff] }
   0xe   :  { %118 = vmatpush.msra.mxu2 %v97_v7  ;;  %145 = vmatpush.msra.mxu3 %v124_v12  ;;  %v170_v17 = vld [vmem:[#allocation4 + $0x23] ss:$0 sm:$0xff] }
  0x8a   :  { %v66_v4 = vpop.f32.mrf.mxu0 }
  0x8b   :  { %v67_v5 = vadd.f32 %v167_v3, %v66_v4 }
  0x8d   :  { %v69_v6 = vmax.f32 %v67_v5, 0.0 }
  0x8f   :  { %160 = vmatmul.msk.f32.vlgmr.msra.gmra.mxu1 %vm45_vm0, %v69_v6 }
 0x10c   :  { %v93_v9 = vpop.f32.mrf.mxu1 }
 0x10d   :  { %v94_v10 = vadd.f32 %v168_v8, %v93_v9 }
 0x10f   :  { %v96_v11 = vmax.f32 %v94_v10, 0.0 }
 0x111   :  { %161 = vmatmul.msk.f32.vlgmr.msra.gmra.mxu2 %vm45_vm0, %v96_v11 }
 0x194   :  { %v120_v14 = vpop.f32.mrf.mxu2 }
 0x195   :  { %v121_v15 = vadd.f32 %v169_v13, %v120_v14 }
 0x197   :  { %v123_v16 = vmax.f32 %v121_v15, 0.0 }
 0x199   :  { %162 = vmatmul.msk.f32.vlgmr.msra.gmra.mxu3 %vm45_vm0, %v123_v16 }
 0x21c   :  { %v147_v18 = vpop.f32.mrf.mxu3 }
 0x21d   :  { %v148_v19 = vadd.f32 %v170_v17, %v147_v18 }
 0x21f   :  { %v150_v20 = vmax.f32 %v148_v19, 0.0 }
 0x221   :  { %152 = vst.msk [vmem:[%s257_s2] sm:$0xff] %vm151_vm1, %v150_v20 }
 0x222   :  { %157 = vsyncpa [#allocation3], 1 }
 0x223   :  { %158 = vsyncpa [#allocation5], 1 }

</bundles_post_ra>
